<compile_context>
chip_gen: v6e
topology: v6e:2x2x1
jax: 0.10.0
libtpu: 0.0.40
codegen_flags: <defaults>
</compile_context>

<pallas_src>
import jax
import jax.numpy as jnp
from jax.experimental import pallas as pl
from jax.experimental.pallas import tpu as pltpu

# Unpadded layer sizes (matching the PyTorch module) and lane-padded sizes.
DIMS = (784, 377, 153, 75, 10)
PADDED = (784, 384, 256, 128, 128)  # 784 kept as-is (full-dim block is legal)
NUM_CLASSES = 10
NEG_BIG = -1e30  # finite "minus infinity" baked into padded fc4-bias lanes


def classifier_kernel(x_ref,
                      w1_ref, b1_ref,
                      w2_ref, b2_ref,
                      w3_ref, b3_ref,
                      w4_ref, b4_ref,
                      o_ref):
    # Dropout == identity in eval mode.
    # f32 -> bf16 cast folded into the kernel (saves a standalone XLA pass).
    x = x_ref[...].astype(jnp.bfloat16)  # [TB, 784]

    # fc1 + ReLU
    h = jnp.dot(x, w1_ref[...], preferred_element_type=jnp.float32) + b1_ref[...]
    h = jnp.maximum(h, 0.0).astype(jnp.bfloat16)

    # fc2 + ReLU
    h = jnp.dot(h, w2_ref[...], preferred_element_type=jnp.float32) + b2_ref[...]
    h = jnp.maximum(h, 0.0).astype(jnp.bfloat16)

    # fc3 + ReLU
    h = jnp.dot(h, w3_ref[...], preferred_element_type=jnp.float32) + b3_ref[...]
    h = jnp.maximum(h, 0.0).astype(jnp.bfloat16)

    # fc4 (logits), f32 [TB, 128].  b4 already carries -1e30 in padded lanes,
    # so no in-kernel masking is needed and the log_softmax stays inf-free.
    logits = jnp.dot(h, w4_ref[...], preferred_element_type=jnp.float32) + b4_ref[...]

    # Numerically stable log_softmax along dim=1 (padded lanes contribute
    # exp(-huge) == 0 to the sum).
    m = jnp.max(logits, axis=1, keepdims=True)
    shifted = logits - m
    lse = jnp.log(jnp.sum(jnp.exp(shifted), axis=1, keepdims=True))
    o_ref[...] = (shifted - lse).astype(o_ref.dtype)


def _round_up(n, m):
    return ((n + m - 1) // m) * m


def _choose_tb(B, tb_max=512):
    """Batch-tile rows: sublane/MXU aligned, >= 2 grid steps when B >= 16
    (so v7x's two TensorCores both get work), padding waste bounded."""
    if B < 16:
        return _round_up(max(B, 1), 8)
    n_tiles = max(2, pl.cdiv(B, tb_max))
    align = 128 if B >= 256 else 16  # 128 = MXU-row alignment for large B
    return _round_up(pl.cdiv(B, n_tiles), align)


def init_params(key):
    """Unpadded f32 params matching nn.Linear default init:
    U(-1/sqrt(fan_in), +1/sqrt(fan_in)). Weights stored as [in, out]."""
    params = []
    for i in range(4):
        fan_in, fan_out = DIMS[i], DIMS[i + 1]
        key, kw, kb = jax.random.split(key, 3)
        bound = 1.0 / jnp.sqrt(fan_in)
        w = jax.random.uniform(kw, (fan_in, fan_out), jnp.float32, -bound, bound)
        b = jax.random.uniform(kb, (1, fan_out), jnp.float32, -bound, bound)
        params.append((w, b))
    return params


def pack_params(params):
    """Zero-pad feature dims to lane multiples, cast weights to bf16, and bake
    the padded-logit mask into the fc4 bias (one-time)."""
    packed = []
    for i, (w, b) in enumerate(params):
        kin, kout = PADDED[i], PADDED[i + 1]
        wp = jnp.zeros((kin, kout), jnp.bfloat16)
        wp = wp.at[:w.shape[0], :w.shape[1]].set(w.astype(jnp.bfloat16))
        fill = NEG_BIG if i == 3 else 0.0  # fc4 padded lanes -> -1e30
        bp = jnp.full((1, kout), fill, jnp.float32)
        bp = bp.at[:, :b.shape[1]].set(b)
        packed.append((wp, bp))
    return packed


def classifier_forward(x_nchw, packed_params, *, tb_max=512, out_dtype=jnp.float32):
    """x_nchw: [B, 1, 28, 28] f32 -> log-probs [B, 10] in `out_dtype`.

    (On HBM-bound v6e, out_dtype=jnp.bfloat16 halves output-side traffic.)
    """
    B = x_nchw.shape[0]
    x = x_nchw.reshape(B, -1)  # x.view(x.shape[0], -1); stays f32 (cast is in-kernel)

    tb = _choose_tb(B, tb_max)
    Bp = _round_up(B, tb)
    if Bp != B:
        x = jnp.pad(x, ((0, Bp - B), (0, 0)))

    (w1, b1), (w2, b2), (w3, b3), (w4, b4) = packed_params
    weight_args = (w1, b1, w2, b2, w3, b3, w4, b4)

    grid = (Bp // tb,)
    x_spec = pl.BlockSpec((tb, PADDED[0]), lambda i: (i, 0))
    out_spec = pl.BlockSpec((tb, PADDED[4]), lambda i: (i, 0))
    # Weights / biases: constant block index -> VMEM-resident across batch tiles.
    w_specs = [pl.BlockSpec(a.shape, lambda i: (0, 0)) for a in weight_args]

    w_elems = sum(PADDED[i] * PADDED[i + 1] for i in range(4))
    b_elems = sum(PADDED[i + 1] for i in range(4))
    out_bytes = jnp.dtype(out_dtype).itemsize
    cost = pl.CostEstimate(
        flops=2 * Bp * w_elems,
        transcendentals=Bp * PADDED[4],
        bytes_accessed=(Bp * PADDED[0] * 4          # f32 x read
                        + w_elems * 2 + b_elems * 4  # bf16 weights + f32 biases
                        + Bp * PADDED[4] * out_bytes),
    )

    out = pl.pallas_call(
        classifier_kernel,
        out_shape=jax.ShapeDtypeStruct((Bp, PADDED[4]), out_dtype),
        grid=grid,
        in_specs=[x_spec] + w_specs,
        out_specs=out_spec,
        compiler_params=pltpu.CompilerParams(
            dimension_semantics=("parallel",),
            vmem_limit_bytes=32 << 20,
        ),
        cost_estimate=cost,
    )(x, *weight_args)

    return out[:B, :NUM_CLASSES]


def reference_forward(x_nchw, params):
    """Plain-JAX f32 reference for sanity checking."""
    x = x_nchw.reshape(x_nchw.shape[0], -1)
    (w1, b1), (w2, b2), (w3, b3), (w4, b4) = params
    h = jnp.maximum(x @ w1 + b1, 0.0)
    h = jnp.maximum(h @ w2 + b2, 0.0)
    h = jnp.maximum(h @ w3 + b3, 0.0)
    logits = h @ w4 + b4
    return jax.nn.log_softmax(logits, axis=1)


if __name__ == "__main__":
    key = jax.random.PRNGKey(0)
    key, kx = jax.random.split(key)

    B = 8
    x = jax.random.normal(kx, (B, 1, 28, 28), jnp.float32)  # NCHW -> flattened 784
    params = init_params(key)
    packed = pack_params(params)

    out = classifier_forward(x, packed)
    out = jax.block_until_ready(out)

    ref = reference_forward(x, params)
    assert out.shape == (B, 10)
    # bf16 matmuls with f32 accumulation -> widened tolerance vs f32 reference
    # (intentional precision trade-off for MXU-native inference).
    assert jnp.allclose(out, ref, atol=5e-2, rtol=5e-2), "mismatch vs reference"
    # rows of log_softmax should exp-sum to 1
    assert jnp.allclose(jnp.exp(out).sum(axis=1), 1.0, atol=1e-3)

    print("KERNEL_OK")
</pallas_src>

<mosaic_0001>
module attributes {stable_mosaic.version = 11 : i64} {
  func.func @classifier_kernel(%arg0: i32, %arg1: memref<8x784xf32, #tpu.memory_space<vmem>>, %arg2: memref<784x384xbf16, #tpu.memory_space<vmem>>, %arg3: memref<1x384xf32, #tpu.memory_space<vmem>>, %arg4: memref<384x256xbf16, #tpu.memory_space<vmem>>, %arg5: memref<1x256xf32, #tpu.memory_space<vmem>>, %arg6: memref<256x128xbf16, #tpu.memory_space<vmem>>, %arg7: memref<1x128xf32, #tpu.memory_space<vmem>>, %arg8: memref<128x128xbf16, #tpu.memory_space<vmem>>, %arg9: memref<1x128xf32, #tpu.memory_space<vmem>>, %arg10: memref<8x128xf32, #tpu.memory_space<vmem>>) attributes {dimension_semantics = [#tpu.dimension_semantics<parallel>], iteration_bounds = array<i64: 1>, scalar_prefetch = 0 : i64, scratch_operands = 0 : i64, tpu.core_type = #tpu.core_type<tc>, window_params = [{transform_indices = @transform_0, window_bounds = array<i64: 8, 784>}, {pipeline_mode = #tpu.pipeline_mode<synchronous>, transform_indices = @transform_1, window_bounds = array<i64: 784, 384>}, {pipeline_mode = #tpu.pipeline_mode<synchronous>, transform_indices = @transform_2, window_bounds = array<i64: 1, 384>}, {pipeline_mode = #tpu.pipeline_mode<synchronous>, transform_indices = @transform_3, window_bounds = array<i64: 384, 256>}, {pipeline_mode = #tpu.pipeline_mode<synchronous>, transform_indices = @transform_4, window_bounds = array<i64: 1, 256>}, {pipeline_mode = #tpu.pipeline_mode<synchronous>, transform_indices = @transform_5, window_bounds = array<i64: 256, 128>}, {pipeline_mode = #tpu.pipeline_mode<synchronous>, transform_indices = @transform_6, window_bounds = array<i64: 1, 128>}, {pipeline_mode = #tpu.pipeline_mode<synchronous>, transform_indices = @transform_7, window_bounds = array<i64: 128, 128>}, {pipeline_mode = #tpu.pipeline_mode<synchronous>, transform_indices = @transform_8, window_bounds = array<i64: 1, 128>}, {transform_indices = @transform_9, window_bounds = array<i64: 8, 128>}]} {
    %c0 = arith.constant 0 : index
    %c0_0 = arith.constant 0 : index
    %0 = vector.load %arg1[%c0, %c0_0] : memref<8x784xf32, #tpu.memory_space<vmem>>, vector<8x784xf32>
    %1 = arith.truncf %0 : vector<8x784xf32> to vector<8x784xbf16>
    %c0_1 = arith.constant 0 : index
    %c0_2 = arith.constant 0 : index
    %2 = vector.load %arg2[%c0_1, %c0_2] : memref<784x384xbf16, #tpu.memory_space<vmem>>, vector<784x384xbf16>
    %cst = arith.constant dense<0.000000e+00> : vector<8x384xf32>
    %3 = tpu.matmul %1, %2, %cst {dimension_numbers = #tpu.dot_dimension_numbers<[1], [0], [0], [1], [0, 0, 1, 1], [], []>} : vector<8x784xbf16>, vector<784x384xbf16>, vector<8x384xf32> -> vector<8x384xf32>
    %c0_3 = arith.constant 0 : index
    %c0_4 = arith.constant 0 : index
    %4 = vector.load %arg3[%c0_3, %c0_4] : memref<1x384xf32, #tpu.memory_space<vmem>>, vector<1x384xf32>
    %5 = vector.broadcast %4 : vector<1x384xf32> to vector<8x384xf32>
    %6 = arith.addf %3, %5 : vector<8x384xf32>
    %cst_5 = arith.constant 0.000000e+00 : f32
    %7 = vector.broadcast %cst_5 : f32 to vector<8x384xf32>
    %8 = arith.maximumf %6, %7 : vector<8x384xf32>
    %9 = arith.truncf %8 : vector<8x384xf32> to vector<8x384xbf16>
    %c0_6 = arith.constant 0 : index
    %c0_7 = arith.constant 0 : index
    %10 = vector.load %arg4[%c0_6, %c0_7] : memref<384x256xbf16, #tpu.memory_space<vmem>>, vector<384x256xbf16>
    %cst_8 = arith.constant dense<0.000000e+00> : vector<8x256xf32>
    %11 = tpu.matmul %9, %10, %cst_8 {dimension_numbers = #tpu.dot_dimension_numbers<[1], [0], [0], [1], [0, 0, 1, 1], [], []>} : vector<8x384xbf16>, vector<384x256xbf16>, vector<8x256xf32> -> vector<8x256xf32>
    %c0_9 = arith.constant 0 : index
    %c0_10 = arith.constant 0 : index
    %12 = vector.load %arg5[%c0_9, %c0_10] : memref<1x256xf32, #tpu.memory_space<vmem>>, vector<1x256xf32>
    %13 = vector.broadcast %12 : vector<1x256xf32> to vector<8x256xf32>
    %14 = arith.addf %11, %13 : vector<8x256xf32>
    %cst_11 = arith.constant 0.000000e+00 : f32
    %15 = vector.broadcast %cst_11 : f32 to vector<8x256xf32>
    %16 = arith.maximumf %14, %15 : vector<8x256xf32>
    %17 = arith.truncf %16 : vector<8x256xf32> to vector<8x256xbf16>
    %c0_12 = arith.constant 0 : index
    %c0_13 = arith.constant 0 : index
    %18 = vector.load %arg6[%c0_12, %c0_13] : memref<256x128xbf16, #tpu.memory_space<vmem>>, vector<256x128xbf16>
    %cst_14 = arith.constant dense<0.000000e+00> : vector<8x128xf32>
    %19 = tpu.matmul %17, %18, %cst_14 {dimension_numbers = #tpu.dot_dimension_numbers<[1], [0], [0], [1], [0, 0, 1, 1], [], []>} : vector<8x256xbf16>, vector<256x128xbf16>, vector<8x128xf32> -> vector<8x128xf32>
    %c0_15 = arith.constant 0 : index
    %c0_16 = arith.constant 0 : index
    %20 = vector.load %arg7[%c0_15, %c0_16] : memref<1x128xf32, #tpu.memory_space<vmem>>, vector<1x128xf32>
    %21 = vector.broadcast %20 : vector<1x128xf32> to vector<8x128xf32>
    %22 = arith.addf %19, %21 : vector<8x128xf32>
    %cst_17 = arith.constant 0.000000e+00 : f32
    %23 = vector.broadcast %cst_17 : f32 to vector<8x128xf32>
    %24 = arith.maximumf %22, %23 : vector<8x128xf32>
    %25 = arith.truncf %24 : vector<8x128xf32> to vector<8x128xbf16>
    %c0_18 = arith.constant 0 : index
    %c0_19 = arith.constant 0 : index
    %26 = vector.load %arg8[%c0_18, %c0_19] : memref<128x128xbf16, #tpu.memory_space<vmem>>, vector<128x128xbf16>
    %cst_20 = arith.constant dense<0.000000e+00> : vector<8x128xf32>
    %27 = tpu.matmul %25, %26, %cst_20 {dimension_numbers = #tpu.dot_dimension_numbers<[1], [0], [0], [1], [0, 0, 1, 1], [], []>} : vector<8x128xbf16>, vector<128x128xbf16>, vector<8x128xf32> -> vector<8x128xf32>
    %c0_21 = arith.constant 0 : index
    %c0_22 = arith.constant 0 : index
    %28 = vector.load %arg9[%c0_21, %c0_22] : memref<1x128xf32, #tpu.memory_space<vmem>>, vector<1x128xf32>
    %29 = vector.broadcast %28 : vector<1x128xf32> to vector<8x128xf32>
    %30 = arith.addf %27, %29 : vector<8x128xf32>
    %cst_23 = arith.constant dense<0xFF800000> : vector<8xf32>
    %31 = vector.multi_reduction <maximumf>, %30, %cst_23 [1] : vector<8x128xf32> to vector<8xf32>
    %32 = vector.shape_cast %31 : vector<8xf32> to vector<8x1xf32>
    %33 = vector.broadcast %32 : vector<8x1xf32> to vector<8x128xf32>
    %34 = arith.subf %30, %33 : vector<8x128xf32>
    %35 = math.exp %34 : vector<8x128xf32>
    %cst_24 = arith.constant dense<0.000000e+00> : vector<8xf32>
    %36 = vector.multi_reduction <add>, %35, %cst_24 [1] : vector<8x128xf32> to vector<8xf32>
    %37 = vector.shape_cast %36 : vector<8xf32> to vector<8x1xf32>
    %38 = math.log %37 : vector<8x1xf32>
    %39 = vector.broadcast %38 : vector<8x1xf32> to vector<8x128xf32>
    %40 = arith.subf %34, %39 : vector<8x128xf32>
    %c0_25 = arith.constant 0 : index
    %c0_26 = arith.constant 0 : index
    %41 = vector.load %arg10[%c0_25, %c0_26] : memref<8x128xf32, #tpu.memory_space<vmem>>, vector<8x128xf32>
    tpu.vector_store %arg10[%c0_25, %c0_26], %40 {strides = array<i32>} : memref<8x128xf32, #tpu.memory_space<vmem>>, vector<8x128xf32>,
    return
  }
  func.func @transform_0(%arg0: i32) -> (i32, i32) {
    %c0_i32 = arith.constant 0 : i32
    %c0_i32_0 = arith.constant 0 : i32
    return %arg0, %c0_i32 : i32, i32
  }
  func.func @transform_1(%arg0: i32) -> (i32, i32) {
    %c0_i32 = arith.constant 0 : i32
    %c0_i32_0 = arith.constant 0 : i32
    %c0_i32_1 = arith.constant 0 : i32
    return %c0_i32, %c0_i32_0 : i32, i32
  }
  func.func @transform_2(%arg0: i32) -> (i32, i32) {
    %c0_i32 = arith.constant 0 : i32
    %c0_i32_0 = arith.constant 0 : i32
    %c0_i32_1 = arith.constant 0 : i32
    return %c0_i32, %c0_i32_0 : i32, i32
  }
  func.func @transform_3(%arg0: i32) -> (i32, i32) {
    %c0_i32 = arith.constant 0 : i32
    %c0_i32_0 = arith.constant 0 : i32
    %c0_i32_1 = arith.constant 0 : i32
    return %c0_i32, %c0_i32_0 : i32, i32
  }
  func.func @transform_4(%arg0: i32) -> (i32, i32) {
    %c0_i32 = arith.constant 0 : i32
    %c0_i32_0 = arith.constant 0 : i32
    %c0_i32_1 = arith.constant 0 : i32
    return %c0_i32, %c0_i32_0 : i32, i32
  }
  func.func @transform_5(%arg0: i32) -> (i32, i32) {
    %c0_i32 = arith.constant 0 : i32
    %c0_i32_0 = arith.constant 0 : i32
    %c0_i32_1 = arith.constant 0 : i32
    return %c0_i32, %c0_i32_0 : i32, i32
  }
  func.func @transform_6(%arg0: i32) -> (i32, i32) {
    %c0_i32 = arith.constant 0 : i32
    %c0_i32_0 = arith.constant 0 : i32
    %c0_i32_1 = arith.constant 0 : i32
    return %c0_i32, %c0_i32_0 : i32, i32
  }
  func.func @transform_7(%arg0: i32) -> (i32, i32) {
    %c0_i32 = arith.constant 0 : i32
    %c0_i32_0 = arith.constant 0 : i32
    %c0_i32_1 = arith.constant 0 : i32
    return %c0_i32, %c0_i32_0 : i32, i32
  }
  func.func @transform_8(%arg0: i32) -> (i32, i32) {
    %c0_i32 = arith.constant 0 : i32
    %c0_i32_0 = arith.constant 0 : i32
    %c0_i32_1 = arith.constant 0 : i32
    return %c0_i32, %c0_i32_0 : i32, i32
  }
  func.func @transform_9(%arg0: i32) -> (i32, i32) {
    %c0_i32 = arith.constant 0 : i32
    %c0_i32_0 = arith.constant 0 : i32
    return %arg0, %c0_i32 : i32, i32
  }
}

</mosaic_0001>

<bundles_post_ra>
// kernel: tpu_custom_call.1
= control target key start
LH: loop header
LB: loop body
LE: loop exit
PB: predicated region body
PF: predicated region fallthrough
CT: control target
= control target key end

     0   :  { %14 = vsyncpa [#allocation3], 0  ;;  %s3085_s0 = inlined_call_operand.hbm [shape: f32[8,784], index: 0, kind: input, shape index: {}]   ;;  %s3086_s1 = inlined_call_operand.hbm [shape: bf16[784,384], index: 1, kind: input, shape index: {}]   ;;  %s3087_s2 = inlined_call_operand.vmem [shape: f32[1,384], index: 2, kind: input, shape index: {}]   ;;  %s3088_s3 = inlined_call_operand.hbm [shape: bf16[384,256], index: 3, kind: input, shape index: {}]   ;;  %s3089_s4 = inlined_call_operand.vmem [shape: f32[1,256], index: 4, kind: input, shape index: {}]   ;;  %s3090_s5 = inlined_call_operand.hbm [shape: bf16[256,128], index: 5, kind: input, shape index: {}]   ;;  %s3091_s6 = inlined_call_operand.vmem [shape: f32[1,128], index: 6, kind: input, shape index: {}]   ;;  %s3092_s7 = inlined_call_operand.hbm [shape: bf16[128,128], index: 7, kind: input, shape index: {}]   ;;  %s3093_s8 = inlined_call_operand.vmem [shape: f32[1,128], index: 8, kind: input, shape index: {}]   ;;  %s3094_s9 = inlined_call_operand.hbm [shape: f32[8,128], index: 9, kind: output, shape index: {}]  }
   0x1   :  { %15 = vsyncpa [#allocation6], 0 }
   0x2   :  { %16 = vsyncpa [#allocation9], 0 }
   0x3   :  { %17 = vsyncpa [#allocation4], 0  ;;  %s2934_s30 = smov [#allocation5]  }
   0x4   :  { %s33_s10 = sshll.u32 %s2934_s30, 4  ;;  %s34_s10 = int_to_ptr.vmem [resolvable:$true] %s33_s10 }
   0x5   :  { %s2814_s11 = scalar_lea.vmem %s34_s10, 18816  ;;  %p2819_p1 = scmp.lt.s32.totalorder %s34_s10, %s34_s10 }
   0x6   :  { %p2815_p0 = scmp.ne.s32.totalorder %s34_s10, %s2814_s11  ;;  %p2820_p2 = scmp.lt.s32.totalorder %s2814_s11, %s2814_s11 }
   0x8   :  { %p2821_p3 = por %p2820_p2, %p2819_p1 }
   0xa   :  { %p2822_p4 = pnand %p2821_p3, %p2815_p0 }
   0xc   :  { %2825 = shalt.err (!%p2822_p4)
}
   0xd   :  { %s2935_s12 = smov 192   ;;  %s2936_s13 = smov 12  }
   0xe   :  { %39 = dma.hbm_to_vmem [thread:$0]  %s3086_s1, 18816, %s34_s10, [#allocation6], %s2935_s12, %s2935_s12, %s2936_s13  }
   0xf   :  { %s2937_s16 = smov [#allocation8]  }
  0x10   :  { %s61_s17 = sshll.u32 %s2937_s16, 4  ;;  %s62_s17 = int_to_ptr.vmem [resolvable:$true] %s61_s17 }
  0x11   :  { %s2834_s18 = scalar_lea.vmem %s62_s17, 2048  ;;  %p2839_p6 = scmp.lt.s32.totalorder %s62_s17, %s62_s17 }
  0x12   :  { %p2835_p5 = scmp.ne.s32.totalorder %s62_s17, %s2834_s18  ;;  %p2840_p7 = scmp.lt.s32.totalorder %s2834_s18, %s2834_s18 }
  0x14   :  { %p2841_p8 = por %p2840_p7, %p2839_p6 }
  0x16   :  { %p2842_p9 = pnand %p2841_p8, %p2835_p5 }
  0x18   :  { %2845 = shalt.err (!%p2842_p9)
}
  0x19   :  { %s2938_s19 = smov 64   ;;  %s2939_s20 = smov 4  }
  0x1a   :  { %67 = dma.hbm_to_vmem [thread:$0]  %s3090_s5, 2048, %s62_s17, [#allocation9], %s2938_s19, %s2938_s19, %s2939_s20  }
  0x1b   :  { %s2940_s1 = smov [#allocation2]   ;;  %s2941_s24 = smov [#allocation7]  }
  0x1c   :  { %s24_s23 = sshll.u32 %s2940_s1, 4  ;;  %s47_s25 = sshll.u32 %s2941_s24, 4  ;;  %s25_s23 = int_to_ptr.vmem [resolvable:$true] %s24_s23  ;;  %s48_s25 = int_to_ptr.vmem [resolvable:$true] %s47_s25 }
  0x1d   :  { %s2854_s26 = scalar_lea.vmem %s25_s23, 896  ;;  %p2859_p11 = scmp.lt.s32.totalorder %s25_s23, %s25_s23 }
  0x1e   :  { %p2855_p10 = scmp.ne.s32.totalorder %s25_s23, %s2854_s26  ;;  %p2860_p12 = scmp.lt.s32.totalorder %s2854_s26, %s2854_s26 }
  0x20   :  { %p2861_p13 = por %p2860_p12, %p2859_p11 }
  0x22   :  { %p2862_p0 = pnand %p2861_p13, %p2855_p10 }
  0x24   :  { %2865 = shalt.err (!%p2862_p0)
}
  0x25   :  { %27 = dma.hbm_to_vmem [thread:$0]  %s3085_s0, 896, %s25_s23, [#allocation3]  }
  0x26   :  { %s2874_s29 = scalar_lea.vmem %s48_s25, 6144  ;;  %p2879_p2 = scmp.lt.s32.totalorder %s48_s25, %s48_s25 }
  0x27   :  { %p2875_p1 = scmp.ne.s32.totalorder %s48_s25, %s2874_s29  ;;  %p2880_p3 = scmp.lt.s32.totalorder %s2874_s29, %s2874_s29 }
  0x29   :  { %p2881_p4 = por %p2880_p3, %p2879_p2 }
  0x2b   :  { %p2882_p5 = pnand %p2881_p4, %p2875_p1 }
  0x2d   :  { %2885 = shalt.err (!%p2882_p5)
}
  0x2e   :  { %s2942_s5 = smov 128   ;;  %s2943_s30 = smov 8  }
  0x2f   :  { %53 = dma.hbm_to_vmem [thread:$0]  %s3088_s3, 6144, %s48_s25, [#allocation6], %s2942_s5, %s2942_s5, %s2943_s30  }
  0x30   :  { %s2944_s12 = smov [#allocation10]  }
  0x31   :  { %s75_s13 = sshll.u32 %s2944_s12, 4  ;;  %s76_s13 = int_to_ptr.vmem [resolvable:$true] %s75_s13 }
  0x32   :  { %s2894_s14 = scalar_lea.vmem %s76_s13, 1024  ;;  %p2899_p7 = scmp.lt.s32.totalorder %s76_s13, %s76_s13 }
  0x33   :  { %p2895_p6 = scmp.ne.s32.totalorder %s76_s13, %s2894_s14  ;;  %p2900_p8 = scmp.lt.s32.totalorder %s2894_s14, %s2894_s14 }
  0x35   :  { %p2901_p9 = por %p2900_p8, %p2899_p7 }
  0x37   :  { %p2902_p10 = pnand %p2901_p9, %p2895_p6 }
  0x39   :  { %2905 = shalt.err (!%p2902_p10)
}
  0x3a   :  { %81 = dma.hbm_to_vmem [thread:$0]  %s3092_s7, 1024, %s76_s13, [#allocation9], %s2938_s19, %s2938_s19, %s2939_s20  }
  0x3b   :  { %2926 = dma.done.wait [#allocation3], 896  }
  0x3c   :  { %2927 = vsyncadd [#allocation3], 4294966400 }
  0x3d   :  { %2928 = dma.done.wait [#allocation6], 24960  }
  0x3e   :  { %2929 = vsyncadd [#allocation6], 4294942336 }
  0x3f   :  { %2930 = dma.done.wait [#allocation9], 3072  }
  0x40   :  { %2931 = vsyncadd [#allocation9], 4294964224  ;;  %v2510_v0 = vld [vmem:[#allocation5 + $0xac] ss:$12 sps:$4 sm:$0xff]   ;;  %v2512_v1 = vld [vmem:[#allocation5 + $0xa8] ss:$12 sps:$4 sm:$0xff]  }
  0x41   :  { %1115 = vmatprep.subr.bf16.mxu0 %v2510_v0  ;;  %v2513_v2 = vld [vmem:[#allocation5 + $0x22c] ss:$12 sps:$4 sm:$0xff]   ;;  %v2515_v3 = vld [vmem:[#allocation5 + $0x228] ss:$12 sps:$4 sm:$0xff]   ;;  %v2518_v5 = vld [vmem:[#allocation5 + $0x90] ss:$12 sps:$4 sm:$0xff]  }
  0x42   :  { %1116 = vmatpush1.bf16.msra.mxu0 %v2512_v1  ;;  %v2516_v4 = vld [vmem:[#allocation5 + $0x94] ss:$12 sps:$4 sm:$0xff]   ;;  %1156 = vmatprep.subr.bf16.mxu1 %v2513_v2  ;;  %v2521_v7 = vld [vmem:[#allocation5 + $0x210] ss:$12 sps:$4 sm:$0xff]   ;;  %v2524_v9 = vld [vmem:[#allocation5 + $0x78] ss:$12 sps:$4 sm:$0xff]  }
  0x43   :  { %v2519_v6 = vld [vmem:[#allocation5 + $0x214] ss:$12 sps:$4 sm:$0xff]   ;;  %1157 = vmatpush1.bf16.msra.mxu1 %v2515_v3  ;;  %1117 = vmatprep.subr.bf16.mxu0 %v2516_v4  ;;  %v2522_v8 = vld [vmem:[#allocation5 + $0x7c] ss:$12 sps:$4 sm:$0xff]   ;;  %v2528_v11 = vld [vmem:[#allocation5 + $0x64] ss:$12 sps:$4 sm:$0xff]  }
  0x44   :  { %1158 = vmatprep.subr.bf16.mxu1 %v2519_v6  ;;  %v2525_v10 = vld [vmem:[#allocation5 + $0x1fc] ss:$12 sps:$4 sm:$0xff]   ;;  %v2527_v12 = vld [vmem:[#allocation5 + $0x1f8] ss:$12 sps:$4 sm:$0xff]   ;;  %v2530_v14 = vld [vmem:[#allocation5 + $0x60] ss:$12 sps:$4 sm:$0xff]  }
  0x45   :  { %v2531_v13 = vld [vmem:[#allocation5 + $0x1e4] ss:$12 sps:$4 sm:$0xff]   ;;  %v2534_v15 = vld [vmem:[#allocation5 + $0x4c] ss:$12 sps:$4 sm:$0xff]   ;;  %v2536_v18 = vld [vmem:[#allocation5 + $0x48] ss:$12 sps:$4 sm:$0xff]  }
  0x46   :  { %1118 = vmatpush1.bf16.msra.mxu0 %v2518_v5  ;;  %v2533_v16 = vld [vmem:[#allocation5 + $0x1e0] ss:$12 sps:$4 sm:$0xff]   ;;  %v2539_v20 = vld [vmem:[#allocation5 + $0x1c8] ss:$12 sps:$4 sm:$0xff]   ;;  %v2542_v22 = vld [vmem:[#allocation5 + $0x30] ss:$12 sps:$4 sm:$0xff]  }
  0x47   :  { %1119 = vmatprep.subr.bf16.mxu0 %v2522_v8  ;;  %1159 = vmatpush1.bf16.msra.mxu1 %v2521_v7  ;;  %v2537_v17 = vld [vmem:[#allocation5 + $0x1cc] ss:$12 sps:$4 sm:$0xff]   ;;  %v2540_v19 = vld [vmem:[#allocation5 + $0x34] ss:$12 sps:$4 sm:$0xff]   ;;  %v2546_v23 = vld [vmem:[#allocation5 + $0x1c] ss:$12 sps:$4 sm:$0xff]  }
  0x48   :  { %1160 = vmatprep.subr.bf16.mxu1 %v2525_v10  ;;  %v2543_v21 = vld [vmem:[#allocation5 + $0x1b4] ss:$12 sps:$4 sm:$0xff]   ;;  %v2545_v24 = vld [vmem:[#allocation5 + $0x1b0] ss:$12 sps:$4 sm:$0xff]   ;;  %v2548_v26 = vld [vmem:[#allocation5 + $0x18] ss:$12 sps:$4 sm:$0xff]  }
  0x49   :  { %v2549_v25 = vld [vmem:[#allocation5 + $0x19c] ss:$12 sps:$4 sm:$0xff]   ;;  %v2552_v27 = vld [vmem:[#allocation5 + $0x4] ss:$12 sps:$4 sm:$0xff]   ;;  %v2554_v30 = vld [vmem:[#allocation5] ss:$12 sps:$4 sm:$0xff]  }
  0x4a   :  { %1120 = vmatpush1.bf16.msra.mxu0 %v2524_v9  ;;  %v2551_v28 = vld [vmem:[#allocation5 + $0x198] ss:$12 sps:$4 sm:$0xff]   ;;  %v2557_v32 = vld [vmem:[#allocation5 + $0x180] ss:$12 sps:$4 sm:$0xff]   ;;  %v2560_v34 = vld [vmem:[#allocation5 + $0x168] ss:$12 sps:$4 sm:$0xff]  }
  0x4b   :  { %1121 = vmatprep.subr.bf16.mxu0 %v2528_v11  ;;  %1161 = vmatpush1.bf16.msra.mxu1 %v2527_v12  ;;  %v2555_v29 = vld [vmem:[#allocation5 + $0x184] ss:$12 sps:$4 sm:$0xff]   ;;  %v2558_v31 = vld [vmem:[#allocation5 + $0x16c] ss:$12 sps:$4 sm:$0xff]   ;;  %v2564_v35 = vld [vmem:[#allocation5 + $0x154] ss:$12 sps:$4 sm:$0xff]  }
  0x4c   :  { %1162 = vmatprep.subr.bf16.mxu1 %v2531_v13  ;;  %v2561_v33 = vld [vmem:[#allocation5 + $0x2ec] ss:$12 sps:$4 sm:$0xff]   ;;  %v2563_v36 = vld [vmem:[#allocation5 + $0x2e8] ss:$12 sps:$4 sm:$0xff]   ;;  %v2566_v38 = vld [vmem:[#allocation5 + $0x150] ss:$12 sps:$4 sm:$0xff]  }
  0x4d   :  { %v2567_v37 = vld [vmem:[#allocation5 + $0x2d4] ss:$12 sps:$4 sm:$0xff]   ;;  %v2570_v39 = vld [vmem:[#allocation5 + $0x13c] ss:$12 sps:$4 sm:$0xff]   ;;  %v2572_v42 = vld [vmem:[#allocation5 + $0x138] ss:$12 sps:$4 sm:$0xff]  }
  0x4e   :  { %1122 = vmatpush1.bf16.msra.mxu0 %v2530_v14  ;;  %v2569_v40 = vld [vmem:[#allocation5 + $0x2d0] ss:$12 sps:$4 sm:$0xff]   ;;  %v2575_v44 = vld [vmem:[#allocation5 + $0x2b8] ss:$12 sps:$4 sm:$0xff]   ;;  %v2578_v47 = vld [vmem:[#allocation5 + $0x120] ss:$12 sps:$4 sm:$0xff]  }
  0x4f   :  { %1123 = vmatprep.subr.bf16.mxu0 %v2534_v15  ;;  %1163 = vmatpush1.bf16.msra.mxu1 %v2533_v16  ;;  %v2573_v41 = vld [vmem:[#allocation5 + $0x2bc] ss:$12 sps:$4 sm:$0xff]   ;;  %v2576_v43 = vld [vmem:[#allocation5 + $0x124] ss:$12 sps:$4 sm:$0xff]   ;;  %v2582_v49 = vld [vmem:[#allocation5 + $0x10c] ss:$12 sps:$4 sm:$0xff]  }
  0x50   :  { %1164 = vmatprep.subr.bf16.mxu1 %v2537_v17  ;;  %v2579_v45 = vld [vmem:[#allocation5 + $0x2a4] ss:$12 sps:$4 sm:$0xff]   ;;  %v2581_v51 = vld [vmem:[#allocation5 + $0x2a0] ss:$12 sps:$4 sm:$0xff]   ;;  %v2584_v54 = vld [vmem:[#allocation5 + $0x108] ss:$12 sps:$4 sm:$0xff]  }
  0x51   :  { %v101_v46 = vld [vmem:[#allocation2 + $0x8] sm:$0xff]  ;;  %v103_v50 = vld [vmem:[#allocation2 + $0x18] sm:$0xff]  ;;  %v2585_v53 = vld [vmem:[#allocation5 + $0x28c] ss:$12 sps:$4 sm:$0xff]   ;;  %vm1111_vm0 = vcmask 130048   ;;  %vm2947_vm1 = vmmov 0  }
  0x52   :  { %1124 = vmatpush1.bf16.msra.mxu0 %v2536_v18  ;;  %v108_v48 = vpack.c.bf16 %v101_v46, %v101_v46  ;;  %v3020_v52 = vpack.c.bf16 %v103_v50, %v103_v50  ;;  %v2588_v55 = vld [vmem:[#allocation5 + $0xf4] ss:$12 sps:$4 sm:$0xff]   ;;  %v2590_v58 = vld [vmem:[#allocation5 + $0xf0] ss:$12 sps:$4 sm:$0xff]   ;;  %v2596_v62 = vld [vmem:[#allocation5 + $0xd8] ss:$12 sps:$4 sm:$0xff]  }
  0x53   :  { %1125 = vmatprep.subr.bf16.mxu0 %v2540_v19  ;;  %1165 = vmatpush1.bf16.msra.mxu1 %v2539_v20  ;;  %v2587_v56 = vld [vmem:[#allocation5 + $0x288] ss:$12 sps:$4 sm:$0xff]   ;;  %v2593_v60 = vld [vmem:[#allocation5 + $0x270] ss:$12 sps:$4 sm:$0xff]   ;;  %v2599_v63 = vld [vmem:[#allocation5 + $0x258] ss:$12 sps:$4 sm:$0xff]  }
  0x54   :  { %1166 = vmatprep.subr.bf16.mxu1 %v2543_v21  ;;  %1147 = vmatprep.mubr.bf16.mxu0 %v108_v48  ;;  %v2591_v57 = vld [vmem:[#allocation5 + $0x274] ss:$12 sps:$4 sm:$0xff]   ;;  %v2594_v59 = vld [vmem:[#allocation5 + $0xdc] ss:$12 sps:$4 sm:$0xff]   ;;  %v2600_v0 = vld [vmem:[#allocation5 + $0xc4] ss:$12 sps:$4 sm:$0xff]  }
  0x55   :  { %1188 = vmatprep.mubr.bf16.mxu1 %v3020_v52  ;;  %v2597_v61 = vld [vmem:[#allocation5 + $0x25c] ss:$12 sps:$4 sm:$0xff]   ;;  %v2602_v1 = vld [vmem:[#allocation5 + $0xc0] ss:$12 sps:$4 sm:$0xff]   ;;  %v2603_v2 = vld [vmem:[#allocation5 + $0x244] ss:$12 sps:$4 sm:$0xff]  }
  0x56   :  { %1126 = vmatpush1.bf16.msra.mxu0 %v2542_v22  ;;  %v2605_v3 = vld [vmem:[#allocation5 + $0x240] ss:$12 sps:$4 sm:$0xff]   ;;  %v102_v6 = vld [vmem:[#allocation2 + $0x10] sm:$0xff]  ;;  %v2606_v9 = vld [vmem:[#allocation5 + $0x3a8] ss:$12 sps:$4 sm:$0xff]  }
  0x57   :  { %1127 = vmatprep.subr.bf16.mxu0 %v2546_v23  ;;  %1167 = vmatpush1.bf16.msra.mxu1 %v2545_v24  ;;  %v100_v4 = vld [vmem:[#allocation2] sm:$0xff]  ;;  %v2612_v8 = vld [vmem:[#allocation5 + $0x170] ss:$12 sps:$4 sm:$0xff]   ;;  %v3025_v10 = vpack.c.bf16 %v102_v6, %v102_v6  ;;  %v2611_v11 = vld [vmem:[#allocation5 + $0x394] ss:$12 sps:$4 sm:$0xff]  }
  0x58   :  { %1168 = vmatprep.subr.bf16.mxu1 %v2549_v25  ;;  %v2608_v5 = vld [vmem:[#allocation5 + $0x3ac] ss:$12 sps:$4 sm:$0xff]   ;;  %v3023_v7 = vpack.c.bf16 %v100_v4, %v100_v4  ;;  %v2613_v12 = vld [vmem:[#allocation5 + $0xb0] ss:$12 sps:$4 sm:$0xff]   ;;  %v2627_v21 = vld [vmem:[#allocation5 + $0x128] ss:$12 sps:$4 sm:$0xff]  }
  0x59   :  { %v2617_v13 = vld [vmem:[#allocation5 + $0x158] ss:$12 sps:$4 sm:$0xff]   ;;  %v2609_v14 = vld [vmem:[#allocation5 + $0x390] ss:$12 sps:$4 sm:$0xff]   ;;  %v2622_v17 = vld [vmem:[#allocation5 + $0x140] ss:$12 sps:$4 sm:$0xff]  }
  0x5a   :  { %1128 = vmatpush1.bf16.msra.mxu0 %v2548_v26  ;;  %v2616_v15 = vld [vmem:[#allocation5 + $0x37c] ss:$12 sps:$4 sm:$0xff]   ;;  %v2618_v16 = vld [vmem:[#allocation5 + $0x98] ss:$12 sps:$4 sm:$0xff]   ;;  %v2623_v20 = vld [vmem:[#allocation5 + $0x80] ss:$12 sps:$4 sm:$0xff]  }
  0x5b   :  { %1129 = vmatprep.subr.bf16.mxu0 %v2552_v27  ;;  %1169 = vmatpush1.bf16.msra.mxu1 %v2551_v28  ;;  %v2614_v18 = vld [vmem:[#allocation5 + $0x378] ss:$12 sps:$4 sm:$0xff]   ;;  %v2619_v22 = vld [vmem:[#allocation5 + $0x360] ss:$12 sps:$4 sm:$0xff]   ;;  %v2628_v24 = vld [vmem:[#allocation5 + $0x68] ss:$12 sps:$4 sm:$0xff]  }
  0x5c   :  { %1170 = vmatprep.subr.bf16.mxu1 %v2555_v29  ;;  %v2621_v19 = vld [vmem:[#allocation5 + $0x364] ss:$12 sps:$4 sm:$0xff]   ;;  %v2626_v23 = vld [vmem:[#allocation5 + $0x34c] ss:$12 sps:$4 sm:$0xff]   ;;  %v2624_v26 = vld [vmem:[#allocation5 + $0x348] ss:$12 sps:$4 sm:$0xff]  }
  0x5d   :  { %v2632_v25 = vld [vmem:[#allocation5 + $0x110] ss:$12 sps:$4 sm:$0xff]   ;;  %v2631_v27 = vld [vmem:[#allocation5 + $0x334] ss:$12 sps:$4 sm:$0xff]   ;;  %v2637_v29 = vld [vmem:[#allocation5 + $0xf8] ss:$12 sps:$4 sm:$0xff]  }
  0x5e   :  { %1130 = vmatpush1.bf16.msra.mxu0 %v2554_v30  ;;  %v2633_v28 = vld [vmem:[#allocation5 + $0x50] ss:$12 sps:$4 sm:$0xff]   ;;  %v2658_v50 = vld [vmem:[#allocation5 + $0x218] ss:$12 sps:$4 sm:$0xff]   ;;  %v2683_v6 = vld [vmem:[#allocation5 + $0x1a0] ss:$12 sps:$4 sm:$0xff]  }
  0x5f   :  { %1131 = vmatprep.subr.bf16.mxu0 %v2558_v31  ;;  %1171 = vmatpush1.bf16.msra.mxu1 %v2557_v32  ;;  %v2629_v30 = vld [vmem:[#allocation5 + $0x330] ss:$12 sps:$4 sm:$0xff]   ;;  %v2638_v32 = vld [vmem:[#allocation5 + $0x38] ss:$12 sps:$4 sm:$0xff]  }
  0x60   :  { %1172 = vmatprep.subr.bf16.mxu1 %v2561_v33  ;;  %v2636_v31 = vld [vmem:[#allocation5 + $0x31c] ss:$12 sps:$4 sm:$0xff]   ;;  %v2642_v33 = vld [vmem:[#allocation5 + $0xe0] ss:$12 sps:$4 sm:$0xff]   ;;  %v2674_v4 = vld [vmem:[#allocation5 + $0x3d8] ss:$12 sps:$4 sm:$0xff]  }
  0x61   :  { %v2653_v46 = vld [vmem:[#allocation5 + $0x230] ss:$12 sps:$4 sm:$0xff]  }
  0x62   :  { %1132 = vmatpush2.bf16.msra.mxu0 %v2560_v34  ;;  %v2634_v34 = vld [vmem:[#allocation5 + $0x318] ss:$12 sps:$4 sm:$0xff]  }
  0x63   :  { %1133 = vmatprep.subr.bf16.mxu0 %v2564_v35  ;;  %1173 = vmatpush2.bf16.msra.mxu1 %v2563_v36  ;;  %v2641_v35 = vld [vmem:[#allocation5 + $0x304] ss:$12 sps:$4 sm:$0xff]   ;;  %v2643_v36 = vld [vmem:[#allocation5 + $0x20] ss:$12 sps:$4 sm:$0xff]  }
  0x64   :  { %1174 = vmatprep.subr.bf16.mxu1 %v2567_v37  ;;  %v2647_v37 = vld [vmem:[#allocation5 + $0xc8] ss:$12 sps:$4 sm:$0xff]  }
  0x66   :  { %1134 = vmatpush2.bf16.msra.mxu0 %v2566_v38  ;;  %v2639_v38 = vld [vmem:[#allocation5 + $0x300] ss:$12 sps:$4 sm:$0xff]  }
  0x67   :  { %1135 = vmatprep.subr.bf16.mxu0 %v2570_v39  ;;  %1175 = vmatpush2.bf16.msra.mxu1 %v2569_v40  ;;  %v2646_v39 = vld [vmem:[#allocation5 + $0x46c] ss:$12 sps:$4 sm:$0xff]   ;;  %v2648_v40 = vld [vmem:[#allocation5 + $0x8] ss:$12 sps:$4 sm:$0xff]  }
  0x68   :  { %1176 = vmatprep.subr.bf16.mxu1 %v2573_v41  ;;  %v2652_v41 = vld [vmem:[#allocation5 + $0x2f0] ss:$12 sps:$4 sm:$0xff]  }
  0x6a   :  { %1136 = vmatpush2.bf16.msra.mxu0 %v2572_v42  ;;  %v105_v42 = vld [vmem:[#allocation2 + $0x28] sm:$0xff] }
  0x6b   :  { %1137 = vmatprep.subr.bf16.mxu0 %v2576_v43  ;;  %1177 = vmatpush2.bf16.msra.mxu1 %v2575_v44  ;;  %v2644_v43 = vld [vmem:[#allocation5 + $0x468] ss:$12 sps:$4 sm:$0xff]   ;;  %v3029_v44 = vpack.c.bf16 %v105_v42, %v105_v42  ;;  %v2701_v42 = vld [vmem:[#allocation5 + $0x3e0] ss:$12 sps:$4 sm:$0xff]  }
  0x6c   :  { %1178 = vmatprep.subr.bf16.mxu1 %v2579_v45  ;;  %v2651_v45 = vld [vmem:[#allocation5 + $0x454] ss:$12 sps:$4 sm:$0xff]  }
  0x6e   :  { %1138 = vmatpush2.bf16.msra.mxu0 %v2578_v47  ;;  %v2657_v47 = vld [vmem:[#allocation5 + $0x2d8] ss:$12 sps:$4 sm:$0xff]  }
  0x6f   :  { %1139 = vmatprep.subr.bf16.mxu0 %v2582_v49  ;;  %1179 = vmatpush2.bf16.msra.mxu1 %v2581_v51  ;;  %v2656_v49 = vld [vmem:[#allocation5 + $0x43c] ss:$12 sps:$4 sm:$0xff]   ;;  %v2662_v51 = vld [vmem:[#allocation5 + $0x2c0] ss:$12 sps:$4 sm:$0xff]  }
  0x70   :  { %1180 = vmatprep.subr.bf16.mxu1 %v2585_v53  ;;  %v2654_v53 = vld [vmem:[#allocation5 + $0x438] ss:$12 sps:$4 sm:$0xff]  }
  0x72   :  { %1140 = vmatpush2.bf16.msra.mxu0 %v2584_v54  ;;  %v2661_v54 = vld [vmem:[#allocation5 + $0x424] ss:$12 sps:$4 sm:$0xff]  }
  0x73   :  { %1141 = vmatprep.subr.bf16.mxu0 %v2588_v55  ;;  %1181 = vmatpush2.bf16.msra.mxu1 %v2587_v56  ;;  %v2663_v55 = vld [vmem:[#allocation5 + $0x200] ss:$12 sps:$4 sm:$0xff]   ;;  %v2667_v56 = vld [vmem:[#allocation5 + $0x2a8] ss:$12 sps:$4 sm:$0xff]  }
  0x74   :  { %1182 = vmatprep.subr.bf16.mxu1 %v2591_v57  ;;  %v2659_v57 = vld [vmem:[#allocation5 + $0x420] ss:$12 sps:$4 sm:$0xff]  }
  0x76   :  { %1142 = vmatpush2.bf16.msra.mxu0 %v2590_v58  ;;  %v2666_v58 = vld [vmem:[#allocation5 + $0x40c] ss:$12 sps:$4 sm:$0xff]  }
  0x77   :  { %1143 = vmatprep.subr.bf16.mxu0 %v2594_v59  ;;  %1183 = vmatpush2.bf16.msra.mxu1 %v2593_v60  ;;  %v2668_v59 = vld [vmem:[#allocation5 + $0x1e8] ss:$12 sps:$4 sm:$0xff]   ;;  %v2672_v60 = vld [vmem:[#allocation5 + $0x290] ss:$12 sps:$4 sm:$0xff]  }
  0x78   :  { %1184 = vmatprep.subr.bf16.mxu1 %v2597_v61  ;;  %v2671_v61 = vld [vmem:[#allocation5 + $0x3f4] ss:$12 sps:$4 sm:$0xff]  }
  0x7a   :  { %1144 = vmatpush2.bf16.msra.mxu0 %v2596_v62  ;;  %v2669_v62 = vld [vmem:[#allocation5 + $0x3f0] ss:$12 sps:$4 sm:$0xff]  }
  0x7b   :  { %1145 = vmatprep.subr.bf16.mxu0 %v2600_v0  ;;  %1185 = vmatpush2.bf16.msra.mxu1 %v2599_v63  ;;  %v2673_v63 = vld [vmem:[#allocation5 + $0x1d0] ss:$12 sps:$4 sm:$0xff]   ;;  %v2677_v0 = vld [vmem:[#allocation5 + $0x278] ss:$12 sps:$4 sm:$0xff]  }
  0x7c   :  { %1186 = vmatprep.subr.bf16.mxu1 %v2603_v2  ;;  %v2678_v2 = vld [vmem:[#allocation5 + $0x1b8] ss:$12 sps:$4 sm:$0xff]  }
  0x7e   :  { %1146 = vmatpush2.bf16.msra.mxu0 %v2602_v1  ;;  %v2676_v1 = vld [vmem:[#allocation5 + $0x3dc] ss:$12 sps:$4 sm:$0xff]  }
  0x7f   :  { %1197 = vmatprep.subr.bf16.mxu0 %v2608_v5  ;;  %1187 = vmatpush2.bf16.msra.mxu1 %v2605_v3  ;;  %v2682_v3 = vld [vmem:[#allocation5 + $0x260] ss:$12 sps:$4 sm:$0xff]   ;;  %v2681_v5 = vld [vmem:[#allocation5 + $0x3c4] ss:$12 sps:$4 sm:$0xff]  }
  0x80   :  { %2370 = vmatprep.subr.bf16.mxu1 %v2612_v8  ;;  %v2679_v8 = vld [vmem:[#allocation5 + $0x3c0] ss:$12 sps:$4 sm:$0xff]  }
  0x81   :  { %1148 = vmatmul.mubr.bf16.vlgmr.msra.gmra.mxu0 %v3023_v7 }
  0x82   :  { %1198 = vmatpush1.bf16.msra.mxu0 %v2606_v9  ;;  %1189 = vmatmul.mubr.bf16.vlgmr.msra.gmra.mxu1 %v3025_v10  ;;  %v104_v9 = vld [vmem:[#allocation2 + $0x20] sm:$0xff] }
  0x83   :  { %1199 = vmatprep.subr.bf16.mxu0 %v2611_v11  ;;  %2371 = vmatpush3.bf16.msra.mxu1 %v2613_v12  ;;  %v2686_v11 = vld [vmem:[#allocation5 + $0x484] ss:$12 sps:$4 sm:$0xff]   ;;  %v2688_v12 = vld [vmem:[#allocation5 + $0x188] ss:$12 sps:$4 sm:$0xff]  }
  0x84   :  { %1311 = vmatprep.mubr.bf16.mxu1 %v108_v48  ;;  %2372 = vmatprep.subr.bf16.mxu1 %v2617_v13  ;;  %v2649_v48 = vld [vmem:[#allocation5 + $0x450] ss:$12 sps:$4 sm:$0xff]   ;;  %v2684_v13 = vld [vmem:[#allocation5 + $0x480] ss:$12 sps:$4 sm:$0xff]  }
  0x85   :  { %1229 = vmatprep.mubr.bf16.mxu0 %v3029_v44 }
  0x86   :  { %1200 = vmatpush1.bf16.msra.mxu0 %v2609_v14  ;;  %v3034_v14 = vpack.c.bf16 %v104_v9, %v104_v9  ;;  %v2765_v9 = vld [vmem:[#allocation7 + $0x144] ss:$8 sps:$4 sm:$0xff]  }
  0x87   :  { %1201 = vmatprep.subr.bf16.mxu0 %v2616_v15  ;;  %2373 = vmatpush3.bf16.msra.mxu1 %v2618_v16  ;;  %v2689_v15 = vld [vmem:[#allocation5 + $0x470] ss:$12 sps:$4 sm:$0xff]   ;;  %v2705_v16 = vld [vmem:[#allocation5 + $0x488] ss:$12 sps:$4 sm:$0xff]  }
  0x88   :  { %2374 = vmatprep.subr.bf16.mxu1 %v2622_v17  ;;  %v106_v17 = vld [vmem:[#allocation2 + $0x30] sm:$0xff] }
  0x8a   :  { %1202 = vmatpush1.bf16.msra.mxu0 %v2614_v18  ;;  %v2945_v18 = vmov 0.0  }
  0x8b   :  { %1203 = vmatprep.subr.bf16.mxu0 %v2621_v19  ;;  %2375 = vmatpush3.bf16.msra.mxu1 %v2623_v20  ;;  %v2946_v19 = vmov 0   ;;  %v2690_v20 = vld [vmem:[#allocation5 + $0x3b0] ss:$12 sps:$4 sm:$0xff]  }
  0x8c   :  { %2376 = vmatprep.subr.bf16.mxu1 %v2627_v21  ;;  %v113_v21 = vpack.c.bf16 %v106_v17, %v106_v17  ;;  %v2772_v17 = vld [vmem:[#allocation7 + $0x110] ss:$8 sps:$4 sm:$0xff]  }
  0x8e   :  { %1204 = vmatpush1.bf16.msra.mxu0 %v2619_v22  ;;  %v2691_v22 = vld [vmem:[#allocation5 + $0x458] ss:$12 sps:$4 sm:$0xff]  }
  0x8f   :  { %1205 = vmatprep.subr.bf16.mxu0 %v2626_v23  ;;  %2377 = vmatpush3.bf16.msra.mxu1 %v2628_v24  ;;  %v2708_v23 = vld [vmem:[#allocation7 + $0x74] ss:$8 sps:$4 sm:$0xff]   ;;  %v2706_v24 = vld [vmem:[#allocation7 + $0x70] ss:$8 sps:$4 sm:$0xff]  }
  0x90   :  { %2378 = vmatprep.subr.bf16.mxu1 %v2632_v25  ;;  %v2711_v25 = vld [vmem:[#allocation7 + $0x64] ss:$8 sps:$4 sm:$0xff]  }
  0x92   :  { %1206 = vmatpush1.bf16.msra.mxu0 %v2624_v26  ;;  %v2692_v26 = vld [vmem:[#allocation5 + $0x398] ss:$12 sps:$4 sm:$0xff]  }
  0x93   :  { %1207 = vmatprep.subr.bf16.mxu0 %v2631_v27  ;;  %2379 = vmatpush3.bf16.msra.mxu1 %v2633_v28  ;;  %v2709_v27 = vld [vmem:[#allocation7 + $0x60] ss:$8 sps:$4 sm:$0xff]  }
  0x94   :  { %2380 = vmatprep.subr.bf16.mxu1 %v2637_v29  ;;  %v2694_v28 = vld [vmem:[#allocation5 + $0x380] ss:$12 sps:$4 sm:$0xff]   ;;  %v2695_v29 = vld [vmem:[#allocation5 + $0x428] ss:$12 sps:$4 sm:$0xff]  }
  0x96   :  { %1208 = vmatpush1.bf16.msra.mxu0 %v2629_v30  ;;  %v2714_v30 = vld [vmem:[#allocation7 + $0x54] ss:$8 sps:$4 sm:$0xff]  }
  0x97   :  { %1209 = vmatprep.subr.bf16.mxu0 %v2636_v31  ;;  %2381 = vmatpush3.bf16.msra.mxu1 %v2638_v32  ;;  %v2712_v31 = vld [vmem:[#allocation7 + $0x50] ss:$8 sps:$4 sm:$0xff]   ;;  %v2717_v32 = vld [vmem:[#allocation7 + $0x44] ss:$8 sps:$4 sm:$0xff]  }
  0x98   :  { %2382 = vmatprep.subr.bf16.mxu1 %v2642_v33  ;;  %v2696_v33 = vld [vmem:[#allocation5 + $0x368] ss:$12 sps:$4 sm:$0xff]  }
  0x9a   :  { %1210 = vmatpush1.bf16.msra.mxu0 %v2634_v34  ;;  %v2697_v34 = vld [vmem:[#allocation5 + $0x410] ss:$12 sps:$4 sm:$0xff]  }
  0x9b   :  { %1211 = vmatprep.subr.bf16.mxu0 %v2641_v35  ;;  %2383 = vmatpush3.bf16.msra.mxu1 %v2643_v36  ;;  %v2715_v35 = vld [vmem:[#allocation7 + $0x40] ss:$8 sps:$4 sm:$0xff]   ;;  %v2720_v36 = vld [vmem:[#allocation7 + $0x34] ss:$8 sps:$4 sm:$0xff]  }
  0x9c   :  { %2384 = vmatprep.subr.bf16.mxu1 %v2647_v37  ;;  %v2698_v37 = vld [vmem:[#allocation5 + $0x350] ss:$12 sps:$4 sm:$0xff]  }
  0x9e   :  { %1212 = vmatpush1.bf16.msra.mxu0 %v2639_v38  ;;  %v2699_v38 = vld [vmem:[#allocation5 + $0x3f8] ss:$12 sps:$4 sm:$0xff]  }
  0x9f   :  { %1213 = vmatprep.subr.bf16.mxu0 %v2646_v39  ;;  %2385 = vmatpush3.bf16.msra.mxu1 %v2648_v40  ;;  %v2718_v39 = vld [vmem:[#allocation7 + $0x30] ss:$8 sps:$4 sm:$0xff]   ;;  %v2723_v40 = vld [vmem:[#allocation7 + $0x24] ss:$8 sps:$4 sm:$0xff]  }
  0xa0   :  { %2392 = vmatprep.subr.bf16.mxu1 %v2652_v41  ;;  %v2700_v41 = vld [vmem:[#allocation5 + $0x338] ss:$12 sps:$4 sm:$0xff]  }
  0xa2   :  { %1214 = vmatpush2.bf16.msra.mxu0 %v2644_v43  ;;  %1312 = vmatmul.mubr.bf16.vlgmr.msra.gmra.mxu1 %v3023_v7  ;;  %v2687_v7 = vld [vmem:[#allocation5 + $0x248] ss:$12 sps:$4 sm:$0xff]   ;;  %v2721_v43 = vld [vmem:[#allocation7 + $0x20] ss:$8 sps:$4 sm:$0xff]  }
  0xa3   :  { %1215 = vmatprep.subr.bf16.mxu0 %v2651_v45  ;;  %2393 = vmatpush3.bf16.msra.mxu1 %v2653_v46  ;;  %v2702_v45 = vld [vmem:[#allocation5 + $0x320] ss:$12 sps:$4 sm:$0xff]   ;;  %v2703_v46 = vld [vmem:[#allocation5 + $0x3c8] ss:$12 sps:$4 sm:$0xff]  }
  0xa4   :  { %1351 = vmatprep.mubr.bf16.mxu1 %v3020_v52  ;;  %2394 = vmatprep.subr.bf16.mxu1 %v2657_v47  ;;  %v2664_v52 = vld [vmem:[#allocation5 + $0x408] ss:$12 sps:$4 sm:$0xff]  }
  0xa5   :  { %v2724_v47 = vld [vmem:[#allocation7 + $0x10] ss:$8 sps:$4 sm:$0xff]  }
  0xa6   :  { %1216 = vmatpush2.bf16.msra.mxu0 %v2649_v48  ;;  %v2729_v48 = vld [vmem:[#allocation7 + $0x4] ss:$8 sps:$4 sm:$0xff]  }
  0xa7   :  { %1217 = vmatprep.subr.bf16.mxu0 %v2656_v49  ;;  %2395 = vmatpush3.bf16.msra.mxu1 %v2658_v50  ;;  %v2704_v49 = vld [vmem:[#allocation5 + $0x308] ss:$12 sps:$4 sm:$0xff]   ;;  %v2727_v50 = vld [vmem:[#allocation7] ss:$8 sps:$4 sm:$0xff]  }
  0xa8   :  { %2396 = vmatprep.subr.bf16.mxu1 %v2662_v51  ;;  %v2732_v51 = vld [vmem:[#allocation7 + $0xf4] ss:$8 sps:$4 sm:$0xff]  }
  0xaa   :  { %1218 = vmatpush2.bf16.msra.mxu0 %v2654_v53  ;;  %v2730_v53 = vld [vmem:[#allocation7 + $0xf0] ss:$8 sps:$4 sm:$0xff]  }
  0xab   :  { %1219 = vmatprep.subr.bf16.mxu0 %v2661_v54  ;;  %2397 = vmatpush3.bf16.msra.mxu1 %v2663_v55  ;;  %v2735_v54 = vld [vmem:[#allocation7 + $0xe4] ss:$8 sps:$4 sm:$0xff]   ;;  %v2733_v55 = vld [vmem:[#allocation7 + $0xe0] ss:$8 sps:$4 sm:$0xff]  }
  0xac   :  { %2398 = vmatprep.subr.bf16.mxu1 %v2667_v56  ;;  %v2738_v56 = vld [vmem:[#allocation7 + $0xd4] ss:$8 sps:$4 sm:$0xff]  }
  0xae   :  { %1220 = vmatpush2.bf16.msra.mxu0 %v2659_v57  ;;  %v2736_v57 = vld [vmem:[#allocation7 + $0xd0] ss:$8 sps:$4 sm:$0xff]  }
  0xaf   :  { %1221 = vmatprep.subr.bf16.mxu0 %v2666_v58  ;;  %2399 = vmatpush3.bf16.msra.mxu1 %v2668_v59  ;;  %v2741_v58 = vld [vmem:[#allocation7 + $0xc4] ss:$8 sps:$4 sm:$0xff]   ;;  %v2739_v59 = vld [vmem:[#allocation7 + $0xc0] ss:$8 sps:$4 sm:$0xff]  }
  0xb0   :  { %2400 = vmatprep.subr.bf16.mxu1 %v2672_v60  ;;  %v2744_v60 = vld [vmem:[#allocation7 + $0xb4] ss:$8 sps:$4 sm:$0xff]  }
  0xb2   :  { %1222 = vmatpush2.bf16.msra.mxu0 %v2664_v52  ;;  %v2742_v52 = vld [vmem:[#allocation7 + $0xb0] ss:$8 sps:$4 sm:$0xff]  }
  0xb3   :  { %1223 = vmatprep.subr.bf16.mxu0 %v2671_v61  ;;  %2401 = vmatpush3.bf16.msra.mxu1 %v2673_v63  ;;  %v2747_v61 = vld [vmem:[#allocation7 + $0xa4] ss:$8 sps:$4 sm:$0xff]   ;;  %v2750_v63 = vld [vmem:[#allocation7 + $0x94] ss:$8 sps:$4 sm:$0xff]  }
  0xb4   :  { %2402 = vmatprep.subr.bf16.mxu1 %v2677_v0  ;;  %v2748_v0 = vld [vmem:[#allocation7 + $0x90] ss:$8 sps:$4 sm:$0xff]  }
  0xb6   :  { %1224 = vmatpush2.bf16.msra.mxu0 %v2669_v62  ;;  %v2745_v62 = vld [vmem:[#allocation7 + $0xa0] ss:$8 sps:$4 sm:$0xff]  }
  0xb7   :  { %1225 = vmatprep.subr.bf16.mxu0 %v2676_v1  ;;  %2403 = vmatpush3.bf16.msra.mxu1 %v2678_v2  ;;  %v2753_v1 = vld [vmem:[#allocation7 + $0x84] ss:$8 sps:$4 sm:$0xff]   ;;  %v2751_v2 = vld [vmem:[#allocation7 + $0x80] ss:$8 sps:$4 sm:$0xff]  }
  0xb8   :  { %2404 = vmatprep.subr.bf16.mxu1 %v2682_v3  ;;  %v2754_v3 = vld [vmem:[#allocation7 + $0x170] ss:$8 sps:$4 sm:$0xff]  }
  0xba   :  { %1226 = vmatpush2.bf16.msra.mxu0 %v2674_v4  ;;  %v2756_v4 = vld [vmem:[#allocation7 + $0x174] ss:$8 sps:$4 sm:$0xff]  }
  0xbb   :  { %1227 = vmatprep.subr.bf16.mxu0 %v2681_v5  ;;  %2405 = vmatpush3.bf16.msra.mxu1 %v2683_v6  ;;  %v2759_v5 = vld [vmem:[#allocation7 + $0x164] ss:$8 sps:$4 sm:$0xff]   ;;  %v2757_v6 = vld [vmem:[#allocation7 + $0x160] ss:$8 sps:$4 sm:$0xff]  }
  0xbc   :  { %2406 = vmatprep.subr.bf16.mxu1 %v2687_v7  ;;  %v2762_v7 = vld [vmem:[#allocation7 + $0x154] ss:$8 sps:$4 sm:$0xff]  }
  0xbe   :  { %1228 = vmatpush2.bf16.msra.mxu0 %v2679_v8  ;;  %v2760_v8 = vld [vmem:[#allocation7 + $0x150] ss:$8 sps:$4 sm:$0xff]  }
  0xbf   :  { %1252 = vmatprep.subr.bf16.mxu0 %v2686_v11  ;;  %2407 = vmatpush3.bf16.msra.mxu1 %v2688_v12  ;;  %v2763_v11 = vld [vmem:[#allocation7 + $0x140] ss:$8 sps:$4 sm:$0xff]   ;;  %v2768_v12 = vld [vmem:[#allocation7 + $0x134] ss:$8 sps:$4 sm:$0xff]  }
  0xc0   :  { %2469 = vmatprep.subr.bf16.mxu1 %v2945_v18 }
  0xc1   :  { %1230 = vmatmul.mubr.bf16.vlgmr.msra.gmra.mxu0 %v3034_v14 }
  0xc2   :  { %1253 = vmatpush1.bf16.msra.mxu0 %v2684_v13  ;;  %1270 = vmatprep.mubr.bf16.mxu0 %v2946_v19  ;;  %v2766_v13 = vld [vmem:[#allocation7 + $0x130] ss:$8 sps:$4 sm:$0xff]  }
  0xc3   :  { %1352 = vmatmul.mubr.bf16.vlgmr.msra.gmra.mxu1 %v3025_v10  ;;  %2414 = vmatprep.subr.bf16.mxu0 %v2689_v15  ;;  %v2693_v10 = vld [vmem:[#allocation5 + $0x440] ss:$12 sps:$4 sm:$0xff]  }
  0xc4   :  { %2470 = vmatpush3.bf16.msra.mxu1 %v2705_v16  ;;  %2471 = vmatprep.mubr.msk.bf16.mxu1 %vm2947_vm1, %v2945_v18  ;;  %v2769_v15 = vld [vmem:[#allocation7 + $0x120] ss:$8 sps:$4 sm:$0xff]   ;;  %v2774_v16 = vld [vmem:[#allocation7 + $0x114] ss:$8 sps:$4 sm:$0xff]  }
  0xc5   :  { %1745 = vmatprep.subr.bf16.mxu1 %v2708_v23 }
  0xc9   :  { %2294 = vmatmul.mubr.msk.bf16.vlgmr.msra.gmra.mxu0 %vm1111_vm0, %v113_v21 }
  0xca   :  { %2415 = vmatpush3.bf16.msra.mxu0 %v2690_v20  ;;  %1391 = vmatprep.mubr.bf16.mxu0 %v3029_v44  ;;  %v2726_v44 = vld [vmem:[#allocation7 + $0x14] ss:$8 sps:$4 sm:$0xff]   ;;  %v2775_v20 = vld [vmem:[#allocation7 + $0x100] ss:$8 sps:$4 sm:$0xff]  }
  0xcb   :  { %2416 = vmatprep.subr.bf16.mxu0 %v2691_v22  ;;  %2472 = vmatmul.mubr.msk.bf16.vlgmr.msra.gmra.mxu1 %vm1111_vm0, %v113_v21  ;;  %v312_v21 = vlaneseq }
  0xcc   :  { %1746 = vmatpush1.bf16.msra.mxu1 %v2706_v24  ;;  %v310_v24 = vld [vmem:[%s3087_s2] sm:$0x7] }
  0xcd   :  { %1747 = vmatprep.subr.bf16.mxu1 %v2711_v25  ;;  %v3048_v22 = vshrl.u32 %v312_v21, 7  ;;  %v2779_v21 = vld [vmem:[#allocation8 + $0x38] sm:$0xff]  }
  0xce   :  { %2417 = vmatpush3.bf16.msra.mxu0 %v2692_v26 }
  0xcf   :  { %2418 = vmatprep.subr.bf16.mxu0 %v2693_v10  ;;  %v314_v23 = vsub.s32 0, %v3048_v22  ;;  %v318_v25 = vsub.s32 1, %v3048_v22 }
  0xd0   :  { %1748 = vmatpush1.bf16.msra.mxu1 %v2709_v27 }
  0xd1   :  { %1749 = vmatprep.subr.bf16.mxu1 %v2714_v30  ;;  %v315_v26 = vrot.slane %v310_v24, %v314_v23  ;;  %v319_v10 = vrot.slane %v310_v24, %v318_v25 }
  0xd2   :  { %2419 = vmatpush3.bf16.msra.mxu0 %v2694_v28 }
  0xd3   :  { %2420 = vmatprep.subr.bf16.mxu0 %v2695_v29 }
  0xd4   :  { %1750 = vmatpush1.bf16.msra.mxu1 %v2712_v31 }
  0xd5   :  { %1751 = vmatprep.subr.bf16.mxu1 %v2717_v32 }
  0xd6   :  { %2421 = vmatpush3.bf16.msra.mxu0 %v2696_v33 }
  0xd7   :  { %2422 = vmatprep.subr.bf16.mxu0 %v2697_v34 }
  0xd8   :  { %1752 = vmatpush1.bf16.msra.mxu1 %v2715_v35 }
  0xd9   :  { %1753 = vmatprep.subr.bf16.mxu1 %v2720_v36 }
  0xda   :  { %2423 = vmatpush3.bf16.msra.mxu0 %v2698_v37 }
  0xdb   :  { %2424 = vmatprep.subr.bf16.mxu0 %v2699_v38 }
  0xdc   :  { %1754 = vmatpush1.bf16.msra.mxu1 %v2718_v39 }
  0xdd   :  { %1755 = vmatprep.subr.bf16.mxu1 %v2723_v40 }
  0xde   :  { %2425 = vmatpush3.bf16.msra.mxu0 %v2700_v41 }
  0xdf   :  { %2426 = vmatprep.subr.bf16.mxu0 %v2701_v42 }
  0xe0   :  { %1756 = vmatpush1.bf16.msra.mxu1 %v2721_v43 }
  0xe1   :  { %1757 = vmatprep.subr.bf16.mxu1 %v2726_v44 }
  0xe2   :  { %2427 = vmatpush3.bf16.msra.mxu0 %v2702_v45 }
  0xe3   :  { %2428 = vmatprep.subr.bf16.mxu0 %v2703_v46 }
  0xe4   :  { %1758 = vmatpush1.bf16.msra.mxu1 %v2724_v47 }
  0xe5   :  { %1759 = vmatprep.subr.bf16.mxu1 %v2729_v48 }
  0xe6   :  { %2429 = vmatpush3.bf16.msra.mxu0 %v2704_v49 }
  0xe7   :  { %1786 = vmatprep.subr.bf16.mxu0 %v2756_v4  ;;  %v322_v4 = vsub.s32 2, %v3048_v22  ;;  %v2800_v22 = vld [vmem:[#allocation10 + $0x8] sm:$0xff]  }
  0xe8   :  { %1760 = vmatpush1.bf16.msra.mxu1 %v2727_v50 }
  0xe9   :  { %1392 = vmatmul.mubr.bf16.vlgmr.msra.gmra.mxu0 %v3034_v14  ;;  %1761 = vmatprep.subr.bf16.mxu1 %v2732_v51  ;;  %v2771_v14 = vld [vmem:[#allocation7 + $0x124] ss:$8 sps:$4 sm:$0xff]  }
  0xea   :  { %1818 = vmatprep.mubr.bf16.mxu0 %v2946_v19  ;;  %1787 = vmatpush1.bf16.msra.mxu0 %v2754_v3  ;;  %v2777_v19 = vld [vmem:[#allocation7 + $0x104] ss:$8 sps:$4 sm:$0xff]  }
  0xeb   :  { %1788 = vmatprep.subr.bf16.mxu0 %v2759_v5  ;;  %v323_v5 = vrot.slane %v310_v24, %v322_v4  ;;  %v2782_v24 = vld [vmem:[#allocation8 + $0x68] sm:$0xff]  }
  0xec   :  { %1762 = vmatpush2.bf16.msra.mxu1 %v2730_v53 }
  0xed   :  { %1763 = vmatprep.subr.bf16.mxu1 %v2735_v54 }
  0xee   :  { %1789 = vmatpush1.bf16.msra.mxu0 %v2757_v6 }
  0xef   :  { %1790 = vmatprep.subr.bf16.mxu0 %v2762_v7 }
  0xf0   :  { %1764 = vmatpush2.bf16.msra.mxu1 %v2733_v55 }
  0xf1   :  { %1765 = vmatprep.subr.bf16.mxu1 %v2738_v56 }
  0xf2   :  { %1791 = vmatpush1.bf16.msra.mxu0 %v2760_v8 }
  0xf3   :  { %1792 = vmatprep.subr.bf16.mxu0 %v2765_v9 }
  0xf4   :  { %1766 = vmatpush2.bf16.msra.mxu1 %v2736_v57 }
  0xf5   :  { %1767 = vmatprep.subr.bf16.mxu1 %v2741_v58 }
  0xf6   :  { %1793 = vmatpush1.bf16.msra.mxu0 %v2763_v11 }
  0xf7   :  { %1794 = vmatprep.subr.bf16.mxu0 %v2768_v12 }
  0xf8   :  { %1768 = vmatpush2.bf16.msra.mxu1 %v2739_v59 }
  0xf9   :  { %1769 = vmatprep.subr.bf16.mxu1 %v2744_v60 }
  0xfa   :  { %1795 = vmatpush1.bf16.msra.mxu0 %v2766_v13 }
  0xfb   :  { %1796 = vmatprep.subr.bf16.mxu0 %v2771_v14 }
  0xfc   :  { %1770 = vmatpush2.bf16.msra.mxu1 %v2742_v52 }
  0xfd   :  { %1771 = vmatprep.subr.bf16.mxu1 %v2747_v61 }
  0xfe   :  { %1797 = vmatpush1.bf16.msra.mxu0 %v2769_v15 }
  0xff   :  { %1798 = vmatprep.subr.bf16.mxu0 %v2774_v16 }
 0x100   :  { %1772 = vmatpush2.bf16.msra.mxu1 %v2745_v62 }
 0x101   :  { %1773 = vmatprep.subr.bf16.mxu1 %v2750_v63 }
 0x102   :  { %1799 = vmatpush1.bf16.msra.mxu0 %v2772_v17 }
 0x103   :  { %1800 = vmatprep.subr.bf16.mxu0 %v2777_v19 }
 0x104   :  { %1774 = vmatpush2.bf16.msra.mxu1 %v2748_v0 }
 0x105   :  { %1775 = vmatprep.subr.bf16.mxu1 %v2753_v1 }
 0x106   :  { %1801 = vmatpush1.bf16.msra.mxu0 %v2775_v20  ;;  %v2778_v20 = vld [vmem:[#allocation8 + $0x78] sm:$0xff]  }
 0x107   :  { %2438 = vmatprep.subr.bf16.mxu0 %v2778_v20 }
 0x108   :  { %1776 = vmatpush2.bf16.msra.mxu1 %v2751_v2 }
 0x109   :  { %2475 = vmatprep.subr.bf16.mxu1 %v2945_v18 }
 0x141   :  { %v1149_v27 = vpop.f32.mrf.mxu0 }
 0x142   :  { %v1150_v28 = vadd.f32 %v1149_v27, %v315_v26  ;;  %v1190_v30 = vpop.f32.mrf.mxu1  ;;  %v2780_v26 = vld [vmem:[#allocation8 + $0x70] sm:$0xff]   ;;  %v2783_v27 = vld [vmem:[#allocation8 + $0x28] sm:$0xff]  }
 0x143   :  { %v1151_v29 = vpop.f32.mrf.mxu0 }
 0x144   :  { %v1152_v31 = vadd.f32 %v1151_v29, %v319_v10  ;;  %v1191_v32 = vadd.f32 %v1190_v30, %v1150_v28  ;;  %v1192_v34 = vpop.f32.mrf.mxu1  ;;  %v2781_v10 = vld [vmem:[#allocation8 + $0x30] sm:$0xff]   ;;  %v2784_v28 = vld [vmem:[#allocation8 + $0x60] sm:$0xff]   ;;  %v2786_v30 = vld [vmem:[#allocation8 + $0x58] sm:$0xff]  }
 0x145   :  { %v1153_v33 = vpop.f32.mrf.mxu0  ;;  %v2785_v29 = vld [vmem:[#allocation8 + $0x20] sm:$0xff]  }
 0x146   :  { %v1193_v35 = vadd.f32 %v1192_v34, %v1152_v31  ;;  %v1194_v37 = vpop.f32.mrf.mxu1  ;;  %v2787_v31 = vld [vmem:[#allocation8 + $0x18] sm:$0xff]   ;;  %v2789_v33 = vld [vmem:[#allocation8 + $0x10] sm:$0xff]   ;;  %v2790_v34 = vld [vmem:[#allocation8 + $0x48] sm:$0xff]  }
 0x147   :  { %v1154_v36 = vpop.f32.mrf.mxu0  ;;  %v2793_v37 = vld [vmem:[#allocation8] sm:$0xff]  }
 0x148   :  { %v1195_v38 = vpop.f32.mrf.mxu1  ;;  %v2792_v36 = vld [vmem:[#allocation8 + $0x40] sm:$0xff]  }
 0x149   :  { %v2794_v38 = vld [vmem:[#allocation10 + $0x38] sm:$0xff]  }
 0x162   :  { %v2386_v39 = vpop.f32.mrf.mxu1 }
 0x164   :  { %v2387_v40 = vpop.f32.mrf.mxu1 }
 0x165   :  { %v2388_v41 = vadd.f32 %v2387_v40, %v2386_v39  ;;  %v2795_v39 = vld [vmem:[#allocation10 + $0x30] sm:$0xff]   ;;  %v2796_v40 = vld [vmem:[#allocation10 + $0x28] sm:$0xff]  }
 0x166   :  { %v2389_v42 = vpop.f32.mrf.mxu1 }
 0x167   :  { %v1314_v6 = vadd.f32 %v2388_v41, %v323_v5  ;;  %v2797_v41 = vld [vmem:[#allocation10 + $0x20] sm:$0xff]   ;;  %v2798_v42 = vld [vmem:[#allocation10 + $0x18] sm:$0xff]  }
 0x168   :  { %v2390_v43 = vpop.f32.mrf.mxu1 }
 0x181   :  { %v1231_v44 = vpop.f32.mrf.mxu0 }
 0x182   :  { %v1232_v51 = vadd.f32 %v1231_v44, %v1191_v32  ;;  %v2788_v32 = vld [vmem:[#allocation8 + $0x50] sm:$0xff]  }
 0x183   :  { %v1233_v45 = vpop.f32.mrf.mxu0  ;;  %v2408_v46 = vpop.f32.mrf.mxu1 }
 0x184   :  { %v1234_v55 = vadd.f32 %v1233_v45, %v1193_v35  ;;  %v2791_v35 = vld [vmem:[#allocation8 + $0x8] sm:$0xff]  }
 0x185   :  { %v1235_v47 = vpop.f32.mrf.mxu0  ;;  %v2409_v48 = vpop.f32.mrf.mxu1 }
 0x186   :  { %v2410_v7 = vadd.f32 %v2409_v48, %v2408_v46  ;;  %v1493_v47 = vld [vmem:[%s3089_s4] sm:$0x3] }
 0x187   :  { %v1236_v49 = vpop.f32.mrf.mxu0  ;;  %v2411_v50 = vpop.f32.mrf.mxu1  ;;  %v1498_v48 = vrot.slane %v1493_v47, %v314_v23  ;;  %v2801_v23 = vld [vmem:[#allocation10] sm:$0xff]  }
 0x188   :  { %v1354_v11 = vadd.f32 %v2410_v7, %v1314_v6  ;;  %v1502_v49 = vrot.slane %v1493_v47, %v318_v25  ;;  %v2361_v7 = vld [vmem:[%s3093_s8] ss:$0 sm:$0xff] }
 0x189   :  { %v1272_v53 = vpop.f32.mrf.mxu0  ;;  %v2412_v54 = vpop.f32.mrf.mxu1 }
 0x18a   :  { %v1273_v56 = vadd.f32 %v1272_v53, %v1232_v51 }
 0x18b   :  { %v1274_v57 = vpop.f32.mrf.mxu0  ;;  %v1433_v58 = vpop.f32.mrf.mxu1 }
 0x18c   :  { %v1275_v59 = vadd.f32 %v1274_v57, %v1234_v55  ;;  %v1439_v60 = vmax.f32 %v1273_v56, 0.0 }
 0x18d   :  { %v1276_v52 = vpop.f32.mrf.mxu0  ;;  %v2473_v61 = vpop.f32.mrf.mxu1 }
 0x18e   :  { %v1440_v62 = vmax.f32 %v1275_v59, 0.0  ;;  %v1442_v2 = vpack.c.bf16 %v1439_v60, %v1439_v60 }
 0x18f   :  { %v1277_v63 = vpop.f32.mrf.mxu0  ;;  %v1436_v0 = vpop.f32.mrf.mxu1 }
 0x190   :  { %v1443_v1 = vpack.c.bf16 %v1440_v62, %v1440_v62  ;;  %v2799_v62 = vld [vmem:[#allocation10 + $0x10] sm:$0xff]  }
 0x191   :  { %v2474_v3 = vpop.f32.mrf.mxu1  ;;  %v2344_v63 = vld [vmem:[%s3091_s6] ss:$0 sm:$0xff]  ;;  %s2948_s6 = smov [#allocation11]  }
 0x192   :  { %1777 = vmatprep.mubr.bf16.mxu1 %v1443_v1  ;;  %s2136_s20 = sshll.u32 %s2948_s6, 4  ;;  %s2137_s20 = int_to_ptr.vmem [resolvable:$true] %s2136_s20 }
 0x193   :  { %1778 = vmatmul.mubr.bf16.vlgmr.msra.gmra.mxu1 %v1442_v2  ;;  %s2906_s8 = scalar_lea.vmem %s2137_s20, 128  ;;  %p2911_p12 = scmp.lt.s32.totalorder %s2137_s20, %s2137_s20 }
 0x194   :  { %2491 = vmatprep.mubr.msk.bf16.mxu1 %vm2947_vm1, %v2945_v18  ;;  %2476 = vmatpush3.bf16.msra.mxu1 %v2794_v38  ;;  %p2907_p11 = scmp.ne.s32.totalorder %s2137_s20, %s2906_s8  ;;  %p2912_p13 = scmp.lt.s32.totalorder %s2906_s8, %s2906_s8 }
 0x195   :  { %2477 = vmatprep.subr.bf16.mxu1 %v2945_v18 }
 0x196   :  { %p2913_p0 = por %p2912_p13, %p2911_p12 }
 0x198   :  { %2478 = vmatpush3.bf16.msra.mxu1 %v2795_v39  ;;  %p2914_p1 = pnand %p2913_p0, %p2907_p11 }
 0x199   :  { %2479 = vmatprep.subr.bf16.mxu1 %v2945_v18 }
 0x19c   :  { %2480 = vmatpush3.bf16.msra.mxu1 %v2796_v40 }
 0x19d   :  { %2481 = vmatprep.subr.bf16.mxu1 %v2945_v18 }
 0x1a0   :  { %2482 = vmatpush3.bf16.msra.mxu1 %v2797_v41 }
 0x1a1   :  { %2483 = vmatprep.subr.bf16.mxu1 %v2945_v18 }
 0x1a4   :  { %2484 = vmatpush3.bf16.msra.mxu1 %v2798_v42 }
 0x1a5   :  { %2485 = vmatprep.subr.bf16.mxu1 %v2945_v18 }
 0x1a8   :  { %2486 = vmatpush3.bf16.msra.mxu1 %v2799_v62 }
 0x1a9   :  { %v2430_v8 = vpop.f32.mrf.mxu0  ;;  %2487 = vmatprep.subr.bf16.mxu1 %v2945_v18 }
 0x1ab   :  { %v2431_v9 = vpop.f32.mrf.mxu0 }
 0x1ac   :  { %v2432_v12 = vadd.f32 %v2431_v9, %v2430_v8  ;;  %2488 = vmatpush3.bf16.msra.mxu1 %v2800_v22 }
 0x1ad   :  { %v2433_v13 = vpop.f32.mrf.mxu0  ;;  %2489 = vmatprep.subr.bf16.mxu1 %v2945_v18 }
 0x1ae   :  { %v1394_v14 = vadd.f32 %v2432_v12, %v1354_v11 }
 0x1af   :  { %v2434_v15 = vpop.f32.mrf.mxu0 }
 0x1b0   :  { %v1434_v16 = vadd.f32 %v1433_v58, %v1394_v14  ;;  %2490 = vmatpush3.bf16.msra.mxu1 %v2801_v23 }
 0x1b2   :  { %v1441_v17 = vmax.f32 %v1434_v16, 0.0 }
 0x1b4   :  { %v1444_v19 = vpack.c.bf16 %v1441_v17, %v1441_v17 }
 0x1b6   :  { %1819 = vmatmul.mubr.bf16.vlgmr.msra.gmra.mxu0 %v1444_v19 }
 0x1b7   :  { %2439 = vmatpush3.bf16.msra.mxu0 %v2779_v21 }
 0x1b8   :  { %2440 = vmatprep.subr.bf16.mxu0 %v2780_v26 }
 0x1bb   :  { %2441 = vmatpush3.bf16.msra.mxu0 %v2781_v10 }
 0x1bc   :  { %2442 = vmatprep.subr.bf16.mxu0 %v2782_v24 }
 0x1bf   :  { %2443 = vmatpush3.bf16.msra.mxu0 %v2783_v27 }
 0x1c0   :  { %2444 = vmatprep.subr.bf16.mxu0 %v2784_v28 }
 0x1c3   :  { %2445 = vmatpush3.bf16.msra.mxu0 %v2785_v29 }
 0x1c4   :  { %2446 = vmatprep.subr.bf16.mxu0 %v2786_v30 }
 0x1c7   :  { %2447 = vmatpush3.bf16.msra.mxu0 %v2787_v31 }
 0x1c8   :  { %2448 = vmatprep.subr.bf16.mxu0 %v2788_v32 }
 0x1cb   :  { %2449 = vmatpush3.bf16.msra.mxu0 %v2789_v33 }
 0x1cc   :  { %2450 = vmatprep.subr.bf16.mxu0 %v2790_v34 }
 0x1cf   :  { %2451 = vmatpush3.bf16.msra.mxu0 %v2791_v35 }
 0x1d0   :  { %2452 = vmatprep.subr.bf16.mxu0 %v2792_v36 }
 0x1d3   :  { %2453 = vmatpush3.bf16.msra.mxu0 %v2793_v37 }
 0x253   :  { %v1779_v43 = vpop.f32.mrf.mxu1 }
 0x254   :  { %v1780_v50 = vadd.f32 %v1779_v43, %v1498_v48 }
 0x255   :  { %v1781_v44 = vpop.f32.mrf.mxu1 }
 0x256   :  { %v1782_v53 = vadd.f32 %v1781_v44, %v1502_v49 }
 0x257   :  { %v1783_v45 = vpop.f32.mrf.mxu1 }
 0x259   :  { %v1784_v46 = vpop.f32.mrf.mxu1 }
 0x276   :  { %v1820_v51 = vpop.f32.mrf.mxu0 }
 0x277   :  { %v1821_v54 = vadd.f32 %v1820_v51, %v1780_v50 }
 0x278   :  { %v1822_v55 = vpop.f32.mrf.mxu0 }
 0x279   :  { %v1823_v56 = vadd.f32 %v1822_v55, %v1782_v53  ;;  %v1827_v57 = vmax.f32 %v1821_v54, 0.0 }
 0x27a   :  { %v1824_v58 = vpop.f32.mrf.mxu0 }
 0x27b   :  { %v1828_v59 = vmax.f32 %v1823_v56, 0.0  ;;  %v1829_v61 = vpack.c.bf16 %v1827_v57, %v1827_v57 }
 0x27c   :  { %v1825_v60 = vpop.f32.mrf.mxu0 }
 0x27d   :  { %v1830_v52 = vpack.c.bf16 %v1828_v59, %v1828_v59 }
 0x27f   :  { %1998 = vmatprep.mubr.bf16.mxu0 %v1830_v52 }
 0x280   :  { %1999 = vmatmul.mubr.bf16.vlgmr.msra.gmra.mxu0 %v1829_v61 }
 0x340   :  { %v2454_v25 = vpop.f32.mrf.mxu0 }
 0x342   :  { %v2455_v0 = vpop.f32.mrf.mxu0 }
 0x343   :  { %v2456_v1 = vadd.f32 %v2455_v0, %v2454_v25 }
 0x344   :  { %v2457_v2 = vpop.f32.mrf.mxu0 }
 0x345   :  { %v2001_v3 = vadd.f32 %v2456_v1, %v2344_v63 }
 0x346   :  { %v2458_v4 = vpop.f32.mrf.mxu0 }
 0x347   :  { %v2006_v5 = vmax.f32 %v2001_v3, 0.0 }
 0x349   :  { %v2007_v6 = vpack.c.bf16 %v2006_v5, %v2006_v5 }
 0x34b   :  { %2492 = vmatmul.mubr.bf16.vlgmr.msra.gmra.mxu1 %v2007_v6 }
 0x40b   :  { %v2113_v18 = vpop.f32.mrf.mxu1 }
 0x40c   :  { %v2114_v8 = vadd.f32 %v2361_v7, %v2113_v18 }
 0x40d   :  { %v2493_v9 = vpop.f32.mrf.mxu1 }
 0x40e   :  { %2119 = vmax.xlane.f32.xlu0 %v2114_v8 }
 0x40f   :  { %v2116_v11 = vpop.f32.mrf.mxu1 }
 0x411   :  { %v2494_v12 = vpop.f32.mrf.mxu1 }
 0x497   :  { %v2120_v13 = vpop.xlane.xlu0 %2119 }
 0x498   :  { %v2121_v14 = vsub.f32 %v2114_v8, %v2120_v13 }
 0x49a   :  { %v2122_v15 = vmul.f32 1.442695, %v2121_v14 }
 0x49c   :  { %2802 = vpow2.f32 %v2122_v15 }
 0x4a9   :  { %v2803_v16 = vpop.eup %2802 }
 0x4aa   :  { %2124 = vadd.xlane.f32.xlu0 %v2803_v16 }
 0x533   :  { %v2125_v17 = vpop.xlane.xlu0 %2124 }
 0x534   :  { %2804 = vlog2.f32 %v2125_v17 }
 0x541   :  { %v2805_v19 = vpop.eup %2804 }
 0x542   :  { %v2127_v20 = vmul.f32 0.6931472, %v2805_v19 }
 0x544   :  { %v2128_v21 = vsub.f32 %v2121_v14, %v2127_v20 }
 0x546   :  { %2129 = vst [vmem:[#allocation11] sm:$0xff] %v2128_v21 }
 0x547   :  { %2917 = shalt.err (!%p2914_p1)
}
 0x548   :  { %2139 = dma.vmem_to_hbm [thread:$0]  %s2137_s20, 128, %s3094_s9, [#allocation4]  }
 0x549   :  { %2932 = dma.done.wait [#allocation4], 128  }
 0x54a   :  { %2933 = vsyncadd [#allocation4], 4294967168 }
 0x54b   :  { %2143 = vsyncpa [#allocation3], 1 }
 0x54c   :  { %2144 = vsyncpa [#allocation6], 1 }
 0x54d   :  { %2145 = vsyncpa [#allocation9], 1 }
 0x54e   :  { %2146 = vsyncpa [#allocation4], 1 }

</bundles_post_ra>
